<compile_context>
chip_gen: v7x
topology: tpu7x:2x2x1
jax: 0.10.0
libtpu: 0.0.40
codegen_flags: <defaults>
</compile_context>

<pallas_src>
import functools

import jax
import jax.numpy as jnp
from jax.experimental import pallas as pl
from jax.experimental.pallas import tpu as pltpu


def _round_up(x: int, m: int) -> int:
    return ((x + m - 1) // m) * m


def qnetwork_kernel(x_ref, w1_ref, b1_ref, w2_ref, b2_ref, w3_ref, b3_ref, out_ref):
    # One (TB, state_size) activation tile per grid step; weights are VMEM-resident.
    x = x_ref[...]
    # fc1 + ReLU (MXU matmul, f32 accumulation; bias/ReLU on VPU in f32)
    h1 = jnp.dot(x, w1_ref[...], preferred_element_type=jnp.float32) + b1_ref[...]
    h1 = jnp.maximum(h1, 0.0)
    # fc2 + ReLU
    h2 = jnp.dot(h1.astype(w2_ref.dtype), w2_ref[...],
                 preferred_element_type=jnp.float32) + b2_ref[...]
    h2 = jnp.maximum(h2, 0.0)
    # fc3 (no activation); output slab is lane-dense (padded to 128 columns)
    out_ref[...] = (jnp.dot(h2.astype(w3_ref.dtype), w3_ref[...],
                            preferred_element_type=jnp.float32)
                    + b3_ref[...]).astype(out_ref.dtype)


@functools.partial(jax.jit, static_argnames=("tile_b", "compute_dtype"))
def qnetwork_forward(state, params, *, tile_b=256, compute_dtype=jnp.bfloat16):
    """state: [B, state_size] -> Q-values [B, action_size] float32.

    tile_b: batch tile. 256+ fills the 2x256x256 MXU on v6e/v7x; use 128 on v5e.
    compute_dtype: dtype fed to the MXU (accumulation is always f32).
    """
    w1, b1, w2, b2, w3, b3 = params
    B, S = state.shape
    action_size = w3.shape[1]

    # ---- lane-dense final layer: pad output columns to a multiple of 128 ----
    out_pad = _round_up(action_size, 128)
    w3p = jnp.zeros((w3.shape[0], out_pad), w3.dtype).at[:, :action_size].set(w3)
    b3p = jnp.zeros((1, out_pad), b3.dtype).at[:, :action_size].set(b3)

    # ---- dtype casts: matmul operands in compute_dtype, biases stay f32 ----
    xc = state.astype(compute_dtype)
    w1c = w1.astype(compute_dtype)
    w2c = w2.astype(compute_dtype)
    w3c = w3p.astype(compute_dtype)
    b1f = b1.astype(jnp.float32)
    b2f = b2.astype(jnp.float32)
    b3f = b3p.astype(jnp.float32)

    # ---- batch tiling: pad B up to a multiple of the tile (sublane-aligned) ----
    tb = min(tile_b, _round_up(B, 8))          # don't over-tile tiny batches
    b_pad = _round_up(B, tb)
    if b_pad != B:
        xc = jnp.pad(xc, ((0, b_pad - B), (0, 0)))
    grid = (b_pad // tb,)

    # weight/bias specs: full-array blocks, same block every step -> VMEM-resident
    def _resident(shape):
        return pl.BlockSpec(shape, lambda i: (0, 0))

    out = pl.pallas_call(
        qnetwork_kernel,
        out_shape=jax.ShapeDtypeStruct((b_pad, out_pad), jnp.float32),
        grid=grid,
        in_specs=[
            pl.BlockSpec((tb, S), lambda i: (i, 0)),   # x tile (pipelined)
            _resident(w1c.shape), _resident(b1f.shape),
            _resident(w2c.shape), _resident(b2f.shape),
            _resident(w3c.shape), _resident(b3f.shape),
        ],
        out_specs=pl.BlockSpec((tb, out_pad), lambda i: (i, 0)),
        compiler_params=pltpu.CompilerParams(
            dimension_semantics=("parallel",)),        # megacore-shard the batch axis
    )(xc, w1c, b1f, w2c, b2f, w3c, b3f)

    # strip batch padding and the lane-padding of the output
    return out[:B, :action_size]


def init_qnetwork_params(key, state_size, action_size, fc1_units=64, fc2_units=64):
    """Deterministic init mimicking nn.Linear's U(-1/sqrt(fan_in), 1/sqrt(fan_in))."""
    def linear_init(k, fan_in, fan_out):
        kw, kb = jax.random.split(k)
        bound = 1.0 / jnp.sqrt(float(fan_in))
        w = jax.random.uniform(kw, (fan_in, fan_out), jnp.float32, -bound, bound)
        b = jax.random.uniform(kb, (1, fan_out), jnp.float32, -bound, bound)
        return w, b

    k1, k2, k3 = jax.random.split(key, 3)
    w1, b1 = linear_init(k1, state_size, fc1_units)
    w2, b2 = linear_init(k2, fc1_units, fc2_units)
    w3, b3 = linear_init(k3, fc2_units, action_size)
    return (w1, b1, w2, b2, w3, b3)


def qnetwork_ref(state, params):
    """Pure-JAX f32 reference for correctness checking."""
    w1, b1, w2, b2, w3, b3 = params
    h1 = jnp.maximum(state @ w1 + b1, 0.0)
    h2 = jnp.maximum(h1 @ w2 + b2, 0.0)
    return h2 @ w3 + b3


if __name__ == "__main__":
    key = jax.random.PRNGKey(0)
    k_params, k_state = jax.random.split(key)

    state_size = 8      # e.g. LunarLander-v2 observation dim
    action_size = 4
    batch = 300         # deliberately not a multiple of the tile (exercises padding)

    params = init_qnetwork_params(k_params, state_size, action_size,
                                  fc1_units=64, fc2_units=64)
    state = jax.random.normal(k_state, (batch, state_size), dtype=jnp.float32)

    ref = qnetwork_ref(state, params)

    # f32 compute path: must match the reference tightly.
    out_f32 = qnetwork_forward(state, params, tile_b=256, compute_dtype=jnp.float32)
    out_f32 = jax.block_until_ready(out_f32)
    assert out_f32.shape == (batch, action_size)
    assert jnp.allclose(out_f32, ref, atol=1e-5, rtol=1e-5), "f32 mismatch vs reference"

    # bf16 compute path (default / fast path): looser tolerance from bf16 rounding.
    out_bf16 = qnetwork_forward(state, params, tile_b=256, compute_dtype=jnp.bfloat16)
    out_bf16 = jax.block_until_ready(out_bf16)
    assert out_bf16.shape == (batch, action_size)
    assert jnp.allclose(out_bf16, ref, atol=5e-2, rtol=5e-2), "bf16 mismatch vs reference"

    print("KERNEL_OK")
</pallas_src>

<mosaic_0001>
module attributes {stable_mosaic.version = 11 : i64} {
  func.func @qnetwork_kernel(%arg0: i32, %arg1: memref<256x8xf32, #tpu.memory_space<vmem>>, %arg2: memref<8x64xf32, #tpu.memory_space<vmem>>, %arg3: memref<1x64xf32, #tpu.memory_space<vmem>>, %arg4: memref<64x64xf32, #tpu.memory_space<vmem>>, %arg5: memref<1x64xf32, #tpu.memory_space<vmem>>, %arg6: memref<64x128xf32, #tpu.memory_space<vmem>>, %arg7: memref<1x128xf32, #tpu.memory_space<vmem>>, %arg8: memref<256x128xf32, #tpu.memory_space<vmem>>) attributes {dimension_semantics = [#tpu.dimension_semantics<parallel>], iteration_bounds = array<i64: 2>, scalar_prefetch = 0 : i64, scratch_operands = 0 : i64, tpu.core_type = #tpu.core_type<tc>, window_params = [{transform_indices = @transform_0, window_bounds = array<i64: 256, 8>}, {pipeline_mode = #tpu.pipeline_mode<synchronous>, transform_indices = @transform_1, window_bounds = array<i64: 8, 64>}, {pipeline_mode = #tpu.pipeline_mode<synchronous>, transform_indices = @transform_2, window_bounds = array<i64: 1, 64>}, {pipeline_mode = #tpu.pipeline_mode<synchronous>, transform_indices = @transform_3, window_bounds = array<i64: 64, 64>}, {pipeline_mode = #tpu.pipeline_mode<synchronous>, transform_indices = @transform_4, window_bounds = array<i64: 1, 64>}, {pipeline_mode = #tpu.pipeline_mode<synchronous>, transform_indices = @transform_5, window_bounds = array<i64: 64, 128>}, {pipeline_mode = #tpu.pipeline_mode<synchronous>, transform_indices = @transform_6, window_bounds = array<i64: 1, 128>}, {transform_indices = @transform_7, window_bounds = array<i64: 256, 128>}]} {
    %c0 = arith.constant 0 : index
    %c0_0 = arith.constant 0 : index
    %0 = vector.load %arg1[%c0, %c0_0] : memref<256x8xf32, #tpu.memory_space<vmem>>, vector<256x8xf32>
    %c0_1 = arith.constant 0 : index
    %c0_2 = arith.constant 0 : index
    %1 = vector.load %arg2[%c0_1, %c0_2] : memref<8x64xf32, #tpu.memory_space<vmem>>, vector<8x64xf32>
    %cst = arith.constant dense<0.000000e+00> : vector<256x64xf32>
    %2 = tpu.matmul %0, %1, %cst {dimension_numbers = #tpu.dot_dimension_numbers<[1], [0], [0], [1], [0, 0, 1, 1], [], []>} : vector<256x8xf32>, vector<8x64xf32>, vector<256x64xf32> -> vector<256x64xf32>
    %c0_3 = arith.constant 0 : index
    %c0_4 = arith.constant 0 : index
    %3 = vector.load %arg3[%c0_3, %c0_4] : memref<1x64xf32, #tpu.memory_space<vmem>>, vector<1x64xf32>
    %4 = vector.broadcast %3 : vector<1x64xf32> to vector<256x64xf32>
    %5 = arith.addf %2, %4 : vector<256x64xf32>
    %cst_5 = arith.constant 0.000000e+00 : f32
    %6 = vector.broadcast %cst_5 : f32 to vector<256x64xf32>
    %7 = arith.maximumf %5, %6 : vector<256x64xf32>
    %c0_6 = arith.constant 0 : index
    %c0_7 = arith.constant 0 : index
    %8 = vector.load %arg4[%c0_6, %c0_7] : memref<64x64xf32, #tpu.memory_space<vmem>>, vector<64x64xf32>
    %cst_8 = arith.constant dense<0.000000e+00> : vector<256x64xf32>
    %9 = tpu.matmul %7, %8, %cst_8 {dimension_numbers = #tpu.dot_dimension_numbers<[1], [0], [0], [1], [0, 0, 1, 1], [], []>} : vector<256x64xf32>, vector<64x64xf32>, vector<256x64xf32> -> vector<256x64xf32>
    %c0_9 = arith.constant 0 : index
    %c0_10 = arith.constant 0 : index
    %10 = vector.load %arg5[%c0_9, %c0_10] : memref<1x64xf32, #tpu.memory_space<vmem>>, vector<1x64xf32>
    %11 = vector.broadcast %10 : vector<1x64xf32> to vector<256x64xf32>
    %12 = arith.addf %9, %11 : vector<256x64xf32>
    %cst_11 = arith.constant 0.000000e+00 : f32
    %13 = vector.broadcast %cst_11 : f32 to vector<256x64xf32>
    %14 = arith.maximumf %12, %13 : vector<256x64xf32>
    %c0_12 = arith.constant 0 : index
    %c0_13 = arith.constant 0 : index
    %15 = vector.load %arg6[%c0_12, %c0_13] : memref<64x128xf32, #tpu.memory_space<vmem>>, vector<64x128xf32>
    %cst_14 = arith.constant dense<0.000000e+00> : vector<256x128xf32>
    %16 = tpu.matmul %14, %15, %cst_14 {dimension_numbers = #tpu.dot_dimension_numbers<[1], [0], [0], [1], [0, 0, 1, 1], [], []>} : vector<256x64xf32>, vector<64x128xf32>, vector<256x128xf32> -> vector<256x128xf32>
    %c0_15 = arith.constant 0 : index
    %c0_16 = arith.constant 0 : index
    %17 = vector.load %arg7[%c0_15, %c0_16] : memref<1x128xf32, #tpu.memory_space<vmem>>, vector<1x128xf32>
    %18 = vector.broadcast %17 : vector<1x128xf32> to vector<256x128xf32>
    %19 = arith.addf %16, %18 : vector<256x128xf32>
    %c0_17 = arith.constant 0 : index
    %c0_18 = arith.constant 0 : index
    %20 = vector.load %arg8[%c0_17, %c0_18] : memref<256x128xf32, #tpu.memory_space<vmem>>, vector<256x128xf32>
    tpu.vector_store %arg8[%c0_17, %c0_18], %19 {strides = array<i32>} : memref<256x128xf32, #tpu.memory_space<vmem>>, vector<256x128xf32>,
    return
  }
  func.func @transform_0(%arg0: i32) -> (i32, i32) {
    %c0_i32 = arith.constant 0 : i32
    %c0_i32_0 = arith.constant 0 : i32
    return %arg0, %c0_i32 : i32, i32
  }
  func.func @transform_1(%arg0: i32) -> (i32, i32) {
    %c0_i32 = arith.constant 0 : i32
    %c0_i32_0 = arith.constant 0 : i32
    %c0_i32_1 = arith.constant 0 : i32
    return %c0_i32, %c0_i32_0 : i32, i32
  }
  func.func @transform_2(%arg0: i32) -> (i32, i32) {
    %c0_i32 = arith.constant 0 : i32
    %c0_i32_0 = arith.constant 0 : i32
    %c0_i32_1 = arith.constant 0 : i32
    return %c0_i32, %c0_i32_0 : i32, i32
  }
  func.func @transform_3(%arg0: i32) -> (i32, i32) {
    %c0_i32 = arith.constant 0 : i32
    %c0_i32_0 = arith.constant 0 : i32
    %c0_i32_1 = arith.constant 0 : i32
    return %c0_i32, %c0_i32_0 : i32, i32
  }
  func.func @transform_4(%arg0: i32) -> (i32, i32) {
    %c0_i32 = arith.constant 0 : i32
    %c0_i32_0 = arith.constant 0 : i32
    %c0_i32_1 = arith.constant 0 : i32
    return %c0_i32, %c0_i32_0 : i32, i32
  }
  func.func @transform_5(%arg0: i32) -> (i32, i32) {
    %c0_i32 = arith.constant 0 : i32
    %c0_i32_0 = arith.constant 0 : i32
    %c0_i32_1 = arith.constant 0 : i32
    return %c0_i32, %c0_i32_0 : i32, i32
  }
  func.func @transform_6(%arg0: i32) -> (i32, i32) {
    %c0_i32 = arith.constant 0 : i32
    %c0_i32_0 = arith.constant 0 : i32
    %c0_i32_1 = arith.constant 0 : i32
    return %c0_i32, %c0_i32_0 : i32, i32
  }
  func.func @transform_7(%arg0: i32) -> (i32, i32) {
    %c0_i32 = arith.constant 0 : i32
    %c0_i32_0 = arith.constant 0 : i32
    return %arg0, %c0_i32 : i32, i32
  }
}

</mosaic_0001>

<bundles_post_ra>
// kernel: qnetwork_forward.1
= control target key start
LH: loop header
LB: loop body
LE: loop exit
PB: predicated region body
PF: predicated region fallthrough
CT: control target
= control target key end

     0   :  { %s1960_s24 = smov 0   ;;  %s2319_s0 = inlined_call_operand.vmem [shape: f32[512,8], index: 0, kind: input, shape index: {}]   ;;  %s2320_s1 = inlined_call_operand.vmem [shape: f32[8,64], index: 1, kind: input, shape index: {}]   ;;  %s2321_s2 = inlined_call_operand.vmem [shape: f32[1,64], index: 2, kind: input, shape index: {}]   ;;  %s2322_s3 = inlined_call_operand.vmem [shape: f32[64,64], index: 3, kind: input, shape index: {}]   ;;  %s2323_s4 = inlined_call_operand.vmem [shape: f32[1,64], index: 4, kind: input, shape index: {}]   ;;  %s2324_s5 = inlined_call_operand.vmem [shape: f32[64,128], index: 5, kind: input, shape index: {}]   ;;  %s2325_s6 = inlined_call_operand.vmem [shape: f32[1,128], index: 6, kind: input, shape index: {}]   ;;  %s2326_s7 = inlined_call_operand.vmem [shape: f32[512,128], index: 7, kind: output, shape index: {}]  }
   0x1 LB: > { %s1469_s25 = sadd.s32 4294967295, %s1918_s24   ;;  %p1473_p0 = scmp.ge.s32.totalorder %s1918_s24, 1  ;;  %s1918_s24 = sphi %s1960_s24, %s17_s24  }
   0x2   : > { %p238_p1 = scmp.lt.s32.totalorder %s1918_s24, 3 }
   0x4   : > { %p239_p2 = pnand %p1473_p0, %p238_p1 }
   0x5   : > { %v314_v0 = vld [vmem:[%s2320_s1] sm:$0xff] (!%p239_p2)  ;;  %s1474_s28 = sshll.u32 (!%p239_p2), %s1469_s25, 5  ;;  %v677_v2 = vld [vmem:[%s2322_s3 + $0x8] sm:$0xff] (!%p239_p2)  ;;  %vm322_vm0 = vcmask (!%p239_p2), 64512   ;;  %v678_v7 = vld [vmem:[%s2322_s3 + $0x10] sm:$0xff] (!%p239_p2)  ;;  %vm691_vm1 = vcmask (!%p239_p2), 523264  }
   0x6   : > { %242 = sbr.rel (%p239_p2) target bundleno = 730 (0x2da), region = 48  ;;  %v676_v1 = vld [vmem:[%s2322_s3] sm:$0xff] (!%p239_p2)  ;;  %1692 = vmatprep.subr.mxu0 (!%p239_p2), %v314_v0  ;;  %p271_p3 = scmp.lt.s32.totalorder (!%p239_p2), %s1474_s28, 63  ;;  %1902 = vmatprep.subr.mxu1 (!%p239_p2), %v314_v0  ;;  %v679_v8 = vld [vmem:[%s2322_s3 + $0x18] sm:$0xff] (!%p239_p2)  ;;  %v681_v16 = vld [vmem:[%s2322_s3 + $0x28] sm:$0xff] (!%p239_p2) }
   0x7   : > { %v1870_v3 = vpack.c.bf16 (!%p239_p2), %v677_v2, %v676_v1  ;;  %1693 = vmatpush3.msra.mxu0 (!%p239_p2), %v314_v0  ;;  %1903 = vmatpush3.msra.mxu1 (!%p239_p2), %v314_v0  ;;  %v1874_v13 = vpack.c.bf16 (!%p239_p2), %v679_v8, %v678_v7  ;;  %v680_v15 = vld [vmem:[%s2322_s3 + $0x20] sm:$0xff] (!%p239_p2)  ;;  %v682_v22 = vld [vmem:[%s2322_s3 + $0x30] sm:$0xff] (!%p239_p2)  ;;  %v683_v23 = vld [vmem:[%s2322_s3 + $0x38] sm:$0xff] (!%p239_p2) }
   0x8   : > { %v1878_v21 = vpack.c.bf16 (!%p239_p2), %v681_v16, %v680_v15  ;;  %v1882_v28 = vpack.c.bf16 (!%p239_p2), %v683_v23, %v682_v22  ;;  %v1045_v45 = vld [vmem:[%s2324_s5] sm:$0xff] (!%p239_p2)  ;;  %v1046_v46 = vld [vmem:[%s2324_s5 + $0x8] sm:$0xff] (!%p239_p2)  ;;  %v1047_v47 = vld [vmem:[%s2324_s5 + $0x10] sm:$0xff] (!%p239_p2) }
   0x9   : > { %1871 = vmatprep.subr.bf16.mxu1 (!%p239_p2), %v1870_v3  ;;  %v1886_v48 = vpack.c.bf16 (!%p239_p2), %v1046_v46, %v1045_v45  ;;  %v1048_v49 = vld [vmem:[%s2324_s5 + $0x18] sm:$0xff] (!%p239_p2)  ;;  %v1049_v51 = vld [vmem:[%s2324_s5 + $0x20] sm:$0xff] (!%p239_p2)  ;;  %v1050_v52 = vld [vmem:[%s2324_s5 + $0x28] sm:$0xff] (!%p239_p2) }
   0xa   : > { %v1890_v50 = vpack.c.bf16 (!%p239_p2), %v1048_v49, %v1047_v47  ;;  %v1894_v53 = vpack.c.bf16 (!%p239_p2), %v1050_v52, %v1049_v51  ;;  %v1051_v54 = vld [vmem:[%s2324_s5 + $0x30] sm:$0xff] (!%p239_p2)  ;;  %v1052_v55 = vld [vmem:[%s2324_s5 + $0x38] sm:$0xff] (!%p239_p2)  ;;  %v2096_v57 = vld [vmem:[%s2321_s2] ss:$0 sm:$0xff] (!%p239_p2) }
   0xb   : > { %1887 = vmatprep.subr.bf16.mxu0 (!%p239_p2), %v1886_v48  ;;  %v1898_v56 = vpack.c.bf16 (!%p239_p2), %v1052_v55, %v1051_v54 }
   0xd   : > { %s2328_s28 = smov (!%p271_p3, %s1474_s28), 63 }
   0xe   : > { %s1475_s10 = sshll.u32 %s2328_s28, 3 }
   0xf   : > { %s1985_s13 = scalar_lea.vmem %s2319_s0, %s1475_s10  ;;  %s2250_s9 = scalar_lea.vmem %s2326_s7, %s1475_s10 }
  0x10   : > { %v282_v4 = vld [vmem:[%s1985_s13] sm:$0xff]  ;;  %v283_v5 = vld [vmem:[%s1985_s13 + $0x8] sm:$0xff]  ;;  %v284_v6 = vld [vmem:[%s1985_s13 + $0x10] sm:$0xff] }
  0x11   : > { %1694 = vmatprep.mubr.msk.f32.mxu0 %vm322_vm0, %v282_v4  ;;  %v285_v9 = vld [vmem:[%s1985_s13 + $0x18] sm:$0xff]  ;;  %v286_v10 = vld [vmem:[%s1985_s13 + $0x20] sm:$0xff]  ;;  %v299_v12 = vld [vmem:[%s1985_s13 + $0x88] sm:$0xff] }
  0x12   : > { %1695 = vmatmul.mubr.msk.f32.vlgmr.msra.gmra.mrb[0].mxu0 %vm322_vm0, %v283_v5  ;;  %v298_v11 = vld [vmem:[%s1985_s13 + $0x80] sm:$0xff]  ;;  %v300_v14 = vld [vmem:[%s1985_s13 + $0x90] sm:$0xff]  ;;  %v287_v17 = vld [vmem:[%s1985_s13 + $0x28] sm:$0xff] }
  0x13   : > { %1697 = vmatprep.mubr.msk.f32.mxu0 %vm322_vm0, %v284_v6  ;;  %1718 = vmatprep.mubr.msk.f32.mxu1 %vm322_vm0, %v298_v11  ;;  %v288_v18 = vld [vmem:[%s1985_s13 + $0x30] sm:$0xff]  ;;  %v301_v19 = vld [vmem:[%s1985_s13 + $0x98] sm:$0xff]  ;;  %v302_v20 = vld [vmem:[%s1985_s13 + $0xa0] sm:$0xff] }
  0x14   : > { %1719 = vmatmul.mubr.msk.f32.vlgmr.msra.gmra.mrb[0].mxu1 %vm322_vm0, %v299_v12  ;;  %v289_v24 = vld [vmem:[%s1985_s13 + $0x38] sm:$0xff]  ;;  %v290_v25 = vld [vmem:[%s1985_s13 + $0x40] sm:$0xff]  ;;  %v303_v26 = vld [vmem:[%s1985_s13 + $0xa8] sm:$0xff]  ;;  %1889 = vmatpush3.bf16.msra.mxu0 %v1886_v48 }
  0x15   : > { %1721 = vmatprep.mubr.msk.f32.mxu1 %vm322_vm0, %v300_v14  ;;  %1873 = vmatpush3.bf16.msra.mxu1 %v1870_v3  ;;  %v304_v27 = vld [vmem:[%s1985_s13 + $0xb0] sm:$0xff]  ;;  %v291_v29 = vld [vmem:[%s1985_s13 + $0x48] sm:$0xff]  ;;  %v305_v31 = vld [vmem:[%s1985_s13 + $0xb8] sm:$0xff] }
  0x16   : > { %1698 = vmatmul.mubr.msk.f32.gmra.mrb[2].mxu0 %vm322_vm0, %v285_v9  ;;  %1875 = vmatprep.subr.bf16.mxu1 %v1874_v13  ;;  %v292_v30 = vld [vmem:[%s1985_s13 + $0x50] sm:$0xff]  ;;  %v306_v32 = vld [vmem:[%s1985_s13 + $0xc0] sm:$0xff]  ;;  %v293_v33 = vld [vmem:[%s1985_s13 + $0x58] sm:$0xff] }
  0x17   : > { %1700 = vmatprep.mubr.msk.f32.mxu0 %vm322_vm0, %v286_v10  ;;  %v294_v34 = vld [vmem:[%s1985_s13 + $0x60] sm:$0xff]  ;;  %v307_v35 = vld [vmem:[%s1985_s13 + $0xc8] sm:$0xff]  ;;  %v308_v36 = vld [vmem:[%s1985_s13 + $0xd0] sm:$0xff]  ;;  %1891 = vmatprep.subr.bf16.mxu0 %v1890_v50 }
  0x18   : > { %1722 = vmatmul.mubr.msk.f32.gmra.mrb[2].mxu1 %vm322_vm0, %v301_v19  ;;  %v295_v37 = vld [vmem:[%s1985_s13 + $0x68] sm:$0xff]  ;;  %v296_v38 = vld [vmem:[%s1985_s13 + $0x70] sm:$0xff]  ;;  %v309_v39 = vld [vmem:[%s1985_s13 + $0xd8] sm:$0xff]  ;;  %1893 = vmatpush3.bf16.msra.mxu0 %v1890_v50 }
  0x19   : > { %1724 = vmatprep.mubr.msk.f32.mxu1 %vm322_vm0, %v302_v20  ;;  %1877 = vmatpush3.bf16.msra.mxu1 %v1874_v13  ;;  %v310_v40 = vld [vmem:[%s1985_s13 + $0xe0] sm:$0xff]  ;;  %v297_v41 = vld [vmem:[%s1985_s13 + $0x78] sm:$0xff]  ;;  %v311_v42 = vld [vmem:[%s1985_s13 + $0xe8] sm:$0xff] }
  0x1a   : > { %1701 = vmatmul.mubr.msk.f32.gmra.mrb[4].mxu0 %vm322_vm0, %v287_v17  ;;  %1879 = vmatprep.subr.bf16.mxu1 %v1878_v21  ;;  %v312_v43 = vld [vmem:[%s1985_s13 + $0xf0] sm:$0xff]  ;;  %v313_v44 = vld [vmem:[%s1985_s13 + $0xf8] sm:$0xff] }
  0x1b   : > { %1703 = vmatprep.mubr.msk.f32.mxu0 %vm322_vm0, %v288_v18  ;;  %1895 = vmatprep.subr.bf16.mxu0 %v1894_v53 }
  0x1c   : > { %1725 = vmatmul.mubr.msk.f32.gmra.mrb[4].mxu1 %vm322_vm0, %v303_v26  ;;  %1897 = vmatpush3.bf16.msra.mxu0 %v1894_v53 }
  0x1d   : > { %1727 = vmatprep.mubr.msk.f32.mxu1 %vm322_vm0, %v304_v27  ;;  %1881 = vmatpush3.bf16.msra.mxu1 %v1878_v21 }
  0x1e   : > { %1704 = vmatmul.mubr.msk.f32.gmra.mrb[6].mxu0 %vm322_vm0, %v289_v24  ;;  %1883 = vmatprep.subr.bf16.mxu1 %v1882_v28 }
  0x1f   : > { %1706 = vmatprep.mubr.msk.f32.mxu0 %vm322_vm0, %v290_v25  ;;  %1899 = vmatprep.subr.bf16.mxu0 %v1898_v56 }
  0x20   : > { %1728 = vmatmul.mubr.msk.f32.gmra.mrb[6].mxu1 %vm322_vm0, %v305_v31  ;;  %1901 = vmatpush3.bf16.msra.mxu0 %v1898_v56 }
  0x21   : > { %1730 = vmatprep.mubr.msk.f32.mxu1 %vm322_vm0, %v306_v32  ;;  %1885 = vmatpush3.bf16.msra.mxu1 %v1882_v28 }
  0x22   : > { %1707 = vmatmul.mubr.msk.f32.gmra.mrb[8].mxu0 %vm322_vm0, %v291_v29 }
  0x23   : > { %1709 = vmatprep.mubr.msk.f32.mxu0 %vm322_vm0, %v292_v30 }
  0x24   : > { %1731 = vmatmul.mubr.msk.f32.gmra.mrb[8].mxu1 %vm322_vm0, %v307_v35 }
  0x25   : > { %1733 = vmatprep.mubr.msk.f32.mxu1 %vm322_vm0, %v308_v36 }
  0x26   : > { %1710 = vmatmul.mubr.msk.f32.gmra.mrb[10].mxu0 %vm322_vm0, %v293_v33 }
  0x27   : > { %1712 = vmatprep.mubr.msk.f32.mxu0 %vm322_vm0, %v294_v34 }
  0x28   : > { %1734 = vmatmul.mubr.msk.f32.gmra.mrb[10].mxu1 %vm322_vm0, %v309_v39 }
  0x29   : > { %1736 = vmatprep.mubr.msk.f32.mxu1 %vm322_vm0, %v310_v40 }
  0x2a   : > { %1713 = vmatmul.mubr.msk.f32.gmra.mrb[12].mxu0 %vm322_vm0, %v295_v37 }
  0x2b   : > { %1715 = vmatprep.mubr.msk.f32.mxu0 %vm322_vm0, %v296_v38 }
  0x2c   : > { %1737 = vmatmul.mubr.msk.f32.gmra.mrb[12].mxu1 %vm322_vm0, %v311_v42 }
  0x2d   : > { %1739 = vmatprep.mubr.msk.f32.mxu1 %vm322_vm0, %v312_v43 }
  0x2e   : > { %1716 = vmatmul.mubr.msk.f32.gmra.mrb[14].mxu0 %vm322_vm0, %v297_v41 }
  0x30   : > { %1740 = vmatmul.mubr.msk.f32.gmra.mrb[14].mxu1 %vm322_vm0, %v313_v44 }
  0xe5   : > { %v1696_v58 = vpop.f32.mrb[0].mxu0 }
  0xe6   : > { %v491_v59 = vadd.f32 %v1696_v58, %v2096_v57  ;;  %v485_v60 = vpop.f32.mrb[1].mxu0 }
  0xe7   : > { %v486_v61 = vadd.f32 %v2096_v57, %v485_v60  ;;  %v2101_v3 = vpop.f32.mrb[0].mxu1 }
  0xe8   : > { %v645_v0 = vmax.f32 %v491_v59, 0.0  ;;  %v565_v5 = vpop.f32.mrb[1].mxu1  ;;  %v571_v60 = vadd.f32 %v2101_v3, %v2096_v57 }
  0xe9   : > { %v644_v62 = vmax.f32 %v486_v61, 0.0  ;;  %v1699_v63 = vpop.f32.mrb[2].mxu0  ;;  %v566_v48 = vadd.f32 %v2096_v57, %v565_v5 }
  0xea   : > { %v501_v1 = vadd.f32 %v1699_v63, %v2096_v57  ;;  %v495_v2 = vpop.f32.mrb[3].mxu0 }
  0xeb   : > { %v496_v4 = vadd.f32 %v2096_v57, %v495_v2  ;;  %1758 = vmatprep.mubr.msk.f32.mxu1 %vm691_vm1, %v644_v62  ;;  %v2107_v11 = vpop.f32.mrb[2].mxu1  ;;  %v660_v56 = vmax.f32 %v566_v48, 0.0 }
  0xec   : > { %1759 = vmatmul.mubr.msk.f32.vlgmr.msra.gmra.mrb[16].mxu1 %vm691_vm1, %v645_v0  ;;  %v647_v8 = vmax.f32 %v501_v1, 0.0  ;;  %v575_v13 = vpop.f32.mrb[3].mxu1  ;;  %v661_v1 = vmax.f32 %v571_v60, 0.0  ;;  %v581_v2 = vadd.f32 %v2107_v11, %v2096_v57 }
  0xed   : > { %v646_v6 = vmax.f32 %v496_v4, 0.0  ;;  %v1702_v7 = vpop.f32.mrb[4].mxu0  ;;  %v576_v58 = vadd.f32 %v2096_v57, %v575_v13 }
  0xee   : > { %v511_v9 = vadd.f32 %v1702_v7, %v2096_v57  ;;  %v505_v10 = vpop.f32.mrb[5].mxu0  ;;  %v663_v5 = vmax.f32 %v581_v2, 0.0 }
  0xef   : > { %v506_v12 = vadd.f32 %v2096_v57, %v505_v10  ;;  %1761 = vmatprep.mubr.msk.f32.mxu1 %vm691_vm1, %v646_v6  ;;  %v2113_v19 = vpop.f32.mrb[4].mxu1  ;;  %v662_v63 = vmax.f32 %v576_v58, 0.0 }
  0xf0   : > { %1762 = vmatmul.mubr.msk.f32.gmra.mrb[18].mxu1 %vm691_vm1, %v647_v8  ;;  %v649_v16 = vmax.f32 %v511_v9, 0.0  ;;  %v585_v21 = vpop.f32.mrb[5].mxu1  ;;  %v591_v6 = vadd.f32 %v2113_v19, %v2096_v57 }
  0xf1   : > { %v648_v14 = vmax.f32 %v506_v12, 0.0  ;;  %v1705_v15 = vpop.f32.mrb[6].mxu0  ;;  %v586_v0 = vadd.f32 %v2096_v57, %v585_v21 }
  0xf2   : > { %v521_v17 = vadd.f32 %v1705_v15, %v2096_v57  ;;  %v515_v18 = vpop.f32.mrb[7].mxu0  ;;  %v665_v9 = vmax.f32 %v591_v6, 0.0 }
  0xf3   : > { %v516_v20 = vadd.f32 %v2096_v57, %v515_v18  ;;  %1764 = vmatprep.mubr.msk.f32.mxu1 %vm691_vm1, %v648_v14  ;;  %v1729_v27 = vpop.f32.mrb[6].mxu1  ;;  %v664_v4 = vmax.f32 %v586_v0, 0.0 }
  0xf4   : > { %1765 = vmatmul.mubr.msk.f32.gmra.mrb[20].mxu1 %vm691_vm1, %v649_v16  ;;  %v651_v24 = vmax.f32 %v521_v17, 0.0  ;;  %v595_v29 = vpop.f32.mrb[7].mxu1  ;;  %v601_v10 = vadd.f32 %v1729_v27, %v2096_v57  ;;  %v2174_v27 = vld [vmem:[%s2323_s4] ss:$0 sm:$0xff] }
  0xf5   : > { %v650_v22 = vmax.f32 %v516_v20, 0.0  ;;  %v1708_v23 = vpop.f32.mrb[8].mxu0  ;;  %v596_v3 = vadd.f32 %v2096_v57, %v595_v29 }
  0xf6   : > { %v531_v25 = vadd.f32 %v1708_v23, %v2096_v57  ;;  %v525_v26 = vpop.f32.mrb[9].mxu0  ;;  %v667_v13 = vmax.f32 %v601_v10, 0.0 }
  0xf7   : > { %v526_v28 = vadd.f32 %v2096_v57, %v525_v26  ;;  %1767 = vmatprep.mubr.msk.f32.mxu1 %vm691_vm1, %v650_v22  ;;  %v1732_v35 = vpop.f32.mrb[8].mxu1  ;;  %v666_v7 = vmax.f32 %v596_v3, 0.0 }
  0xf8   : > { %1768 = vmatmul.mubr.msk.f32.gmra.mrb[22].mxu1 %vm691_vm1, %v651_v24  ;;  %v653_v32 = vmax.f32 %v531_v25, 0.0  ;;  %v605_v37 = vpop.f32.mrb[9].mxu1  ;;  %v611_v14 = vadd.f32 %v1732_v35, %v2096_v57 }
  0xf9   : > { %v652_v30 = vmax.f32 %v526_v28, 0.0  ;;  %v1711_v31 = vpop.f32.mrb[10].mxu0  ;;  %v606_v8 = vadd.f32 %v2096_v57, %v605_v37 }
  0xfa   : > { %v541_v33 = vadd.f32 %v1711_v31, %v2096_v57  ;;  %v535_v34 = vpop.f32.mrb[11].mxu0  ;;  %v669_v17 = vmax.f32 %v611_v14, 0.0 }
  0xfb   : > { %v536_v36 = vadd.f32 %v2096_v57, %v535_v34  ;;  %1770 = vmatprep.mubr.msk.f32.mxu1 %vm691_vm1, %v652_v30  ;;  %v1735_v43 = vpop.f32.mrb[10].mxu1  ;;  %v668_v11 = vmax.f32 %v606_v8, 0.0 }
  0xfc   : > { %1771 = vmatmul.mubr.msk.f32.gmra.mrb[24].mxu1 %vm691_vm1, %v653_v32  ;;  %v655_v40 = vmax.f32 %v541_v33, 0.0  ;;  %v615_v45 = vpop.f32.mrb[11].mxu1  ;;  %v621_v18 = vadd.f32 %v1735_v43, %v2096_v57 }
  0xfd   : > { %v654_v38 = vmax.f32 %v536_v36, 0.0  ;;  %v1714_v39 = vpop.f32.mrb[12].mxu0  ;;  %v616_v12 = vadd.f32 %v2096_v57, %v615_v45 }
  0xfe   : > { %v551_v41 = vadd.f32 %v1714_v39, %v2096_v57  ;;  %v545_v42 = vpop.f32.mrb[13].mxu0  ;;  %v671_v21 = vmax.f32 %v621_v18, 0.0 }
  0xff   : > { %v546_v44 = vadd.f32 %v2096_v57, %v545_v42  ;;  %1773 = vmatprep.mubr.msk.f32.mxu1 %vm691_vm1, %v654_v38  ;;  %v1738_v52 = vpop.f32.mrb[12].mxu1  ;;  %v670_v15 = vmax.f32 %v616_v12, 0.0 }
 0x100   : > { %1774 = vmatmul.mubr.msk.f32.gmra.mrb[26].mxu1 %vm691_vm1, %v655_v40  ;;  %v657_v49 = vmax.f32 %v551_v41, 0.0  ;;  %v625_v54 = vpop.f32.mrb[13].mxu1  ;;  %v631_v22 = vadd.f32 %v1738_v52, %v2096_v57 }
 0x101   : > { %v656_v46 = vmax.f32 %v546_v44, 0.0  ;;  %v1717_v47 = vpop.f32.mrb[14].mxu0  ;;  %v626_v16 = vadd.f32 %v2096_v57, %v625_v54 }
 0x102   : > { %v561_v50 = vadd.f32 %v1717_v47, %v2096_v57  ;;  %v555_v51 = vpop.f32.mrb[15].mxu0  ;;  %v673_v24 = vmax.f32 %v631_v22, 0.0 }
 0x103   : > { %v556_v53 = vadd.f32 %v2096_v57, %v555_v51  ;;  %1776 = vmatprep.mubr.msk.f32.mxu1 %vm691_vm1, %v656_v46  ;;  %v1741_v61 = vpop.f32.mrb[14].mxu1  ;;  %v672_v19 = vmax.f32 %v626_v16, 0.0 }
 0x104   : > { %1777 = vmatmul.mubr.msk.f32.gmra.mrb[28].mxu1 %vm691_vm1, %v657_v49  ;;  %v659_v59 = vmax.f32 %v561_v50, 0.0  ;;  %v635_v62 = vpop.f32.mrb[15].mxu1  ;;  %v641_v25 = vadd.f32 %v1741_v61, %v2096_v57 }
 0x105   : > { %v658_v55 = vmax.f32 %v556_v53, 0.0  ;;  %v636_v20 = vadd.f32 %v2096_v57, %v635_v62 }
 0x106   : > { %v675_v26 = vmax.f32 %v641_v25, 0.0 }
 0x107   : > { %1779 = vmatprep.mubr.msk.f32.mxu1 %vm691_vm1, %v658_v55  ;;  %v674_v23 = vmax.f32 %v636_v20, 0.0 }
 0x108   : > { %1780 = vmatmul.mubr.msk.f32.gmra.mrb[30].mxu1 %vm691_vm1, %v659_v59 }
 0x109   : > { %1782 = vmatprep.mubr.msk.f32.mxu1 %vm691_vm1, %v660_v56 }
 0x10c   : > { %1783 = vmatmul.mubr.msk.f32.gmra.mrb[32].mxu1 %vm691_vm1, %v661_v1 }
 0x10d   : > { %1785 = vmatprep.mubr.msk.f32.mxu1 %vm691_vm1, %v662_v63 }
 0x110   : > { %1786 = vmatmul.mubr.msk.f32.gmra.mrb[34].mxu1 %vm691_vm1, %v663_v5 }
 0x111   : > { %1788 = vmatprep.mubr.msk.f32.mxu1 %vm691_vm1, %v664_v4 }
 0x114   : > { %1789 = vmatmul.mubr.msk.f32.gmra.mrb[36].mxu1 %vm691_vm1, %v665_v9 }
 0x115   : > { %1791 = vmatprep.mubr.msk.f32.mxu1 %vm691_vm1, %v666_v7 }
 0x118   : > { %1792 = vmatmul.mubr.msk.f32.gmra.mrb[38].mxu1 %vm691_vm1, %v667_v13 }
 0x119   : > { %1794 = vmatprep.mubr.msk.f32.mxu1 %vm691_vm1, %v668_v11 }
 0x11c   : > { %1795 = vmatmul.mubr.msk.f32.gmra.mrb[40].mxu1 %vm691_vm1, %v669_v17 }
 0x11d   : > { %1797 = vmatprep.mubr.msk.f32.mxu1 %vm691_vm1, %v670_v15 }
 0x120   : > { %1798 = vmatmul.mubr.msk.f32.gmra.mrb[42].mxu1 %vm691_vm1, %v671_v21 }
 0x121   : > { %1800 = vmatprep.mubr.msk.f32.mxu1 %vm691_vm1, %v672_v19 }
 0x124   : > { %1801 = vmatmul.mubr.msk.f32.gmra.mrb[44].mxu1 %vm691_vm1, %v673_v24 }
 0x125   : > { %1803 = vmatprep.mubr.msk.f32.mxu1 %vm691_vm1, %v674_v23 }
 0x128   : > { %1804 = vmatmul.mubr.msk.f32.gmra.mrb[46].mxu1 %vm691_vm1, %v675_v26 }
 0x1bf   : > { %v1760_v28 = vpop.f32.mrb[16].mxu1 }
 0x1c0   : > { %v860_v29 = vadd.f32 %v1760_v28, %v2174_v27  ;;  %v854_v30 = vpop.f32.mrb[17].mxu1 }
 0x1c1   : > { %v855_v31 = vadd.f32 %v2174_v27, %v854_v30 }
 0x1c2   : > { %v1014_v33 = vmax.f32 %v860_v29, 0.0 }
 0x1c3   : > { %v1013_v32 = vmax.f32 %v855_v31, 0.0  ;;  %v1763_v57 = vpop.f32.mrb[18].mxu1 }
 0x1c4   : > { %v870_v34 = vadd.f32 %v1763_v57, %v2174_v27  ;;  %v864_v35 = vpop.f32.mrb[19].mxu1 }
 0x1c5   : > { %v865_v36 = vadd.f32 %v2174_v27, %v864_v35  ;;  %1822 = vmatprep.mubr.msk.f32.mxu0 %vm691_vm1, %v1013_v32 }
 0x1c6   : > { %1823 = vmatmul.mubr.msk.f32.vlgmr.msra.gmra.mrb[16].mxu0 %vm691_vm1, %v1014_v33  ;;  %v1016_v39 = vmax.f32 %v870_v34, 0.0 }
 0x1c7   : > { %v1015_v37 = vmax.f32 %v865_v36, 0.0  ;;  %v1766_v38 = vpop.f32.mrb[20].mxu1 }
 0x1c8   : > { %v880_v40 = vadd.f32 %v1766_v38, %v2174_v27  ;;  %v874_v41 = vpop.f32.mrb[21].mxu1 }
 0x1c9   : > { %v875_v42 = vadd.f32 %v2174_v27, %v874_v41  ;;  %1825 = vmatprep.mubr.msk.f32.mxu0 %vm691_vm1, %v1015_v37 }
 0x1ca   : > { %1826 = vmatmul.mubr.msk.f32.gmra.mrb[18].mxu0 %vm691_vm1, %v1016_v39  ;;  %v1018_v45 = vmax.f32 %v880_v40, 0.0 }
 0x1cb   : > { %v1017_v43 = vmax.f32 %v875_v42, 0.0  ;;  %v1769_v44 = vpop.f32.mrb[22].mxu1 }
 0x1cc   : > { %v890_v46 = vadd.f32 %v1769_v44, %v2174_v27  ;;  %v884_v47 = vpop.f32.mrb[23].mxu1 }
 0x1cd   : > { %v885_v48 = vadd.f32 %v2174_v27, %v884_v47  ;;  %1828 = vmatprep.mubr.msk.f32.mxu0 %vm691_vm1, %v1017_v43 }
 0x1ce   : > { %1829 = vmatmul.mubr.msk.f32.gmra.mrb[20].mxu0 %vm691_vm1, %v1018_v45  ;;  %v1020_v51 = vmax.f32 %v890_v46, 0.0 }
 0x1cf   : > { %v1019_v49 = vmax.f32 %v885_v48, 0.0  ;;  %v1772_v50 = vpop.f32.mrb[24].mxu1 }
 0x1d0   : > { %v900_v52 = vadd.f32 %v1772_v50, %v2174_v27  ;;  %v894_v53 = vpop.f32.mrb[25].mxu1 }
 0x1d1   : > { %v895_v54 = vadd.f32 %v2174_v27, %v894_v53  ;;  %1831 = vmatprep.mubr.msk.f32.mxu0 %vm691_vm1, %v1019_v49 }
 0x1d2   : > { %1832 = vmatmul.mubr.msk.f32.gmra.mrb[22].mxu0 %vm691_vm1, %v1020_v51  ;;  %v1022_v58 = vmax.f32 %v900_v52, 0.0 }
 0x1d3   : > { %v1021_v55 = vmax.f32 %v895_v54, 0.0  ;;  %v1775_v56 = vpop.f32.mrb[26].mxu1 }
 0x1d4   : > { %v910_v59 = vadd.f32 %v1775_v56, %v2174_v27  ;;  %v904_v60 = vpop.f32.mrb[27].mxu1 }
 0x1d5   : > { %v905_v61 = vadd.f32 %v2174_v27, %v904_v60  ;;  %1834 = vmatprep.mubr.msk.f32.mxu0 %vm691_vm1, %v1021_v55 }
 0x1d6   : > { %1835 = vmatmul.mubr.msk.f32.gmra.mrb[24].mxu0 %vm691_vm1, %v1022_v58  ;;  %v1024_v0 = vmax.f32 %v910_v59, 0.0 }
 0x1d7   : > { %v1023_v62 = vmax.f32 %v905_v61, 0.0  ;;  %v1778_v63 = vpop.f32.mrb[28].mxu1  ;;  %v2243_v61 = vld [vmem:[%s2325_s6] ss:$0 sm:$0xff] }
 0x1d8   : > { %v920_v1 = vadd.f32 %v1778_v63, %v2174_v27  ;;  %v914_v2 = vpop.f32.mrb[29].mxu1 }
 0x1d9   : > { %v915_v4 = vadd.f32 %v2174_v27, %v914_v2  ;;  %1837 = vmatprep.mubr.msk.f32.mxu0 %vm691_vm1, %v1023_v62 }
 0x1da   : > { %1838 = vmatmul.mubr.msk.f32.gmra.mrb[26].mxu0 %vm691_vm1, %v1024_v0  ;;  %v1026_v6 = vmax.f32 %v920_v1, 0.0 }
 0x1db   : > { %v1025_v3 = vmax.f32 %v915_v4, 0.0  ;;  %v1781_v5 = vpop.f32.mrb[30].mxu1 }
 0x1dc   : > { %v930_v7 = vadd.f32 %v1781_v5, %v2174_v27  ;;  %v924_v8 = vpop.f32.mrb[31].mxu1 }
 0x1dd   : > { %v925_v9 = vadd.f32 %v2174_v27, %v924_v8  ;;  %1840 = vmatprep.mubr.msk.f32.mxu0 %vm691_vm1, %v1025_v3 }
 0x1de   : > { %1841 = vmatmul.mubr.msk.f32.gmra.mrb[28].mxu0 %vm691_vm1, %v1026_v6  ;;  %v1028_v12 = vmax.f32 %v930_v7, 0.0 }
 0x1df   : > { %v1027_v10 = vmax.f32 %v925_v9, 0.0  ;;  %v1784_v11 = vpop.f32.mrb[32].mxu1 }
 0x1e0   : > { %v940_v13 = vadd.f32 %v1784_v11, %v2174_v27  ;;  %v934_v14 = vpop.f32.mrb[33].mxu1 }
 0x1e1   : > { %v935_v15 = vadd.f32 %v2174_v27, %v934_v14  ;;  %1843 = vmatprep.mubr.msk.f32.mxu0 %vm691_vm1, %v1027_v10 }
 0x1e2   : > { %1844 = vmatmul.mubr.msk.f32.gmra.mrb[30].mxu0 %vm691_vm1, %v1028_v12  ;;  %v1030_v18 = vmax.f32 %v940_v13, 0.0 }
 0x1e3   : > { %v1029_v16 = vmax.f32 %v935_v15, 0.0  ;;  %v1787_v17 = vpop.f32.mrb[34].mxu1 }
 0x1e4   : > { %v950_v19 = vadd.f32 %v1787_v17, %v2174_v27  ;;  %v944_v20 = vpop.f32.mrb[35].mxu1 }
 0x1e5   : > { %v945_v21 = vadd.f32 %v2174_v27, %v944_v20  ;;  %1846 = vmatprep.mubr.msk.f32.mxu0 %vm691_vm1, %v1029_v16 }
 0x1e6   : > { %1847 = vmatmul.mubr.msk.f32.gmra.mrb[32].mxu0 %vm691_vm1, %v1030_v18  ;;  %v1032_v24 = vmax.f32 %v950_v19, 0.0 }
 0x1e7   : > { %v1031_v22 = vmax.f32 %v945_v21, 0.0  ;;  %v1790_v23 = vpop.f32.mrb[36].mxu1 }
 0x1e8   : > { %v960_v25 = vadd.f32 %v1790_v23, %v2174_v27  ;;  %v954_v26 = vpop.f32.mrb[37].mxu1 }
 0x1e9   : > { %v955_v28 = vadd.f32 %v2174_v27, %v954_v26  ;;  %1849 = vmatprep.mubr.msk.f32.mxu0 %vm691_vm1, %v1031_v22 }
 0x1ea   : > { %1850 = vmatmul.mubr.msk.f32.gmra.mrb[34].mxu0 %vm691_vm1, %v1032_v24  ;;  %v1034_v31 = vmax.f32 %v960_v25, 0.0 }
 0x1eb   : > { %v1033_v29 = vmax.f32 %v955_v28, 0.0  ;;  %v1793_v30 = vpop.f32.mrb[38].mxu1 }
 0x1ec   : > { %v970_v32 = vadd.f32 %v1793_v30, %v2174_v27  ;;  %v964_v57 = vpop.f32.mrb[39].mxu1 }
 0x1ed   : > { %v965_v33 = vadd.f32 %v2174_v27, %v964_v57  ;;  %1852 = vmatprep.mubr.msk.f32.mxu0 %vm691_vm1, %v1033_v29 }
 0x1ee   : > { %1853 = vmatmul.mubr.msk.f32.gmra.mrb[36].mxu0 %vm691_vm1, %v1034_v31  ;;  %v1036_v36 = vmax.f32 %v970_v32, 0.0 }
 0x1ef   : > { %v1035_v34 = vmax.f32 %v965_v33, 0.0  ;;  %v1796_v35 = vpop.f32.mrb[40].mxu1 }
 0x1f0   : > { %v980_v37 = vadd.f32 %v1796_v35, %v2174_v27  ;;  %v974_v38 = vpop.f32.mrb[41].mxu1 }
 0x1f1   : > { %v975_v39 = vadd.f32 %v2174_v27, %v974_v38  ;;  %1855 = vmatprep.mubr.msk.f32.mxu0 %vm691_vm1, %v1035_v34 }
 0x1f2   : > { %1856 = vmatmul.mubr.msk.f32.gmra.mrb[38].mxu0 %vm691_vm1, %v1036_v36  ;;  %v1038_v42 = vmax.f32 %v980_v37, 0.0 }
 0x1f3   : > { %v1037_v40 = vmax.f32 %v975_v39, 0.0  ;;  %v1799_v41 = vpop.f32.mrb[42].mxu1 }
 0x1f4   : > { %v990_v43 = vadd.f32 %v1799_v41, %v2174_v27  ;;  %v984_v44 = vpop.f32.mrb[43].mxu1 }
 0x1f5   : > { %v985_v45 = vadd.f32 %v2174_v27, %v984_v44  ;;  %1858 = vmatprep.mubr.msk.f32.mxu0 %vm691_vm1, %v1037_v40 }
 0x1f6   : > { %1859 = vmatmul.mubr.msk.f32.gmra.mrb[40].mxu0 %vm691_vm1, %v1038_v42  ;;  %v1040_v48 = vmax.f32 %v990_v43, 0.0 }
 0x1f7   : > { %v1039_v46 = vmax.f32 %v985_v45, 0.0  ;;  %v1802_v47 = vpop.f32.mrb[44].mxu1 }
 0x1f8   : > { %v1000_v49 = vadd.f32 %v1802_v47, %v2174_v27  ;;  %v994_v50 = vpop.f32.mrb[45].mxu1 }
 0x1f9   : > { %v995_v51 = vadd.f32 %v2174_v27, %v994_v50  ;;  %1861 = vmatprep.mubr.msk.f32.mxu0 %vm691_vm1, %v1039_v46 }
 0x1fa   : > { %1862 = vmatmul.mubr.msk.f32.gmra.mrb[42].mxu0 %vm691_vm1, %v1040_v48  ;;  %v1042_v54 = vmax.f32 %v1000_v49, 0.0 }
 0x1fb   : > { %v1041_v52 = vmax.f32 %v995_v51, 0.0  ;;  %v1805_v53 = vpop.f32.mrb[46].mxu1 }
 0x1fc   : > { %v1010_v55 = vadd.f32 %v1805_v53, %v2174_v27  ;;  %v1004_v56 = vpop.f32.mrb[47].mxu1 }
 0x1fd   : > { %v1005_v58 = vadd.f32 %v2174_v27, %v1004_v56  ;;  %1864 = vmatprep.mubr.msk.f32.mxu0 %vm691_vm1, %v1041_v52 }
 0x1fe   : > { %1865 = vmatmul.mubr.msk.f32.gmra.mrb[44].mxu0 %vm691_vm1, %v1042_v54  ;;  %v1044_v60 = vmax.f32 %v1010_v55, 0.0 }
 0x1ff   : > { %v1043_v59 = vmax.f32 %v1005_v58, 0.0 }
 0x201   : > { %1867 = vmatprep.mubr.msk.f32.mxu0 %vm691_vm1, %v1043_v59 }
 0x202   : > { %1868 = vmatmul.mubr.msk.f32.gmra.mrb[46].mxu0 %vm691_vm1, %v1044_v60 }
 0x299   : > { %v1824_v27 = vpop.f32.mrb[16].mxu0 }
 0x29a   : > { %v1228_v62 = vadd.f32 %v1824_v27, %v2243_v61  ;;  %v1222_v63 = vpop.f32.mrb[17].mxu0 }
 0x29b   : > { %v1223_v0 = vadd.f32 %v2243_v61, %v1222_v63 }
 0x29c   : > { %1382 = vst [vmem:[%s2250_s9 + $0x8] sm:$0xff] %v1228_v62 }
 0x29d   : > { %1381 = vst [vmem:[%s2250_s9] sm:$0xff] %v1223_v0  ;;  %v1827_v1 = vpop.f32.mrb[18].mxu0 }
 0x29e   : > { %v1238_v2 = vadd.f32 %v1827_v1, %v2243_v61  ;;  %v1232_v4 = vpop.f32.mrb[19].mxu0 }
 0x29f   : > { %v1233_v3 = vadd.f32 %v2243_v61, %v1232_v4 }
 0x2a0   : > { %1384 = vst [vmem:[%s2250_s9 + $0x18] sm:$0xff] %v1238_v2 }
 0x2a1   : > { %1383 = vst [vmem:[%s2250_s9 + $0x10] sm:$0xff] %v1233_v3  ;;  %v1830_v5 = vpop.f32.mrb[20].mxu0 }
 0x2a2   : > { %v1248_v6 = vadd.f32 %v1830_v5, %v2243_v61  ;;  %v1242_v7 = vpop.f32.mrb[21].mxu0 }
 0x2a3   : > { %v1243_v8 = vadd.f32 %v2243_v61, %v1242_v7 }
 0x2a4   : > { %1386 = vst [vmem:[%s2250_s9 + $0x28] sm:$0xff] %v1248_v6 }
 0x2a5   : > { %1385 = vst [vmem:[%s2250_s9 + $0x20] sm:$0xff] %v1243_v8  ;;  %v1833_v9 = vpop.f32.mrb[22].mxu0 }
 0x2a6   : > { %v1258_v10 = vadd.f32 %v1833_v9, %v2243_v61  ;;  %v1252_v11 = vpop.f32.mrb[23].mxu0 }
 0x2a7   : > { %v1253_v12 = vadd.f32 %v2243_v61, %v1252_v11 }
 0x2a8   : > { %1388 = vst [vmem:[%s2250_s9 + $0x38] sm:$0xff] %v1258_v10 }
 0x2a9   : > { %1387 = vst [vmem:[%s2250_s9 + $0x30] sm:$0xff] %v1253_v12  ;;  %v1836_v13 = vpop.f32.mrb[24].mxu0 }
 0x2aa   : > { %v1268_v14 = vadd.f32 %v1836_v13, %v2243_v61  ;;  %v1262_v15 = vpop.f32.mrb[25].mxu0 }
 0x2ab   : > { %v1263_v16 = vadd.f32 %v2243_v61, %v1262_v15 }
 0x2ac   : > { %1390 = vst [vmem:[%s2250_s9 + $0x48] sm:$0xff] %v1268_v14 }
 0x2ad   : > { %1389 = vst [vmem:[%s2250_s9 + $0x40] sm:$0xff] %v1263_v16  ;;  %v1839_v17 = vpop.f32.mrb[26].mxu0 }
 0x2ae   : > { %v1278_v18 = vadd.f32 %v1839_v17, %v2243_v61  ;;  %v1272_v19 = vpop.f32.mrb[27].mxu0 }
 0x2af   : > { %v1273_v20 = vadd.f32 %v2243_v61, %v1272_v19 }
 0x2b0   : > { %1392 = vst [vmem:[%s2250_s9 + $0x58] sm:$0xff] %v1278_v18 }
 0x2b1   : > { %1391 = vst [vmem:[%s2250_s9 + $0x50] sm:$0xff] %v1273_v20  ;;  %v1842_v21 = vpop.f32.mrb[28].mxu0 }
 0x2b2   : > { %v1288_v22 = vadd.f32 %v1842_v21, %v2243_v61  ;;  %v1282_v23 = vpop.f32.mrb[29].mxu0 }
 0x2b3   : > { %v1283_v24 = vadd.f32 %v2243_v61, %v1282_v23 }
 0x2b4   : > { %1394 = vst [vmem:[%s2250_s9 + $0x68] sm:$0xff] %v1288_v22 }
 0x2b5   : > { %1393 = vst [vmem:[%s2250_s9 + $0x60] sm:$0xff] %v1283_v24  ;;  %v1845_v25 = vpop.f32.mrb[30].mxu0 }
 0x2b6   : > { %v1298_v26 = vadd.f32 %v1845_v25, %v2243_v61  ;;  %v1292_v28 = vpop.f32.mrb[31].mxu0 }
 0x2b7   : > { %v1293_v29 = vadd.f32 %v2243_v61, %v1292_v28 }
 0x2b8   : > { %1396 = vst [vmem:[%s2250_s9 + $0x78] sm:$0xff] %v1298_v26 }
 0x2b9   : > { %1395 = vst [vmem:[%s2250_s9 + $0x70] sm:$0xff] %v1293_v29  ;;  %v1848_v30 = vpop.f32.mrb[32].mxu0 }
 0x2ba   : > { %v1308_v31 = vadd.f32 %v1848_v30, %v2243_v61  ;;  %v1302_v32 = vpop.f32.mrb[33].mxu0 }
 0x2bb   : > { %v1303_v57 = vadd.f32 %v2243_v61, %v1302_v32 }
 0x2bc   : > { %1398 = vst [vmem:[%s2250_s9 + $0x88] sm:$0xff] %v1308_v31 }
 0x2bd   : > { %1397 = vst [vmem:[%s2250_s9 + $0x80] sm:$0xff] %v1303_v57  ;;  %v1851_v33 = vpop.f32.mrb[34].mxu0 }
 0x2be   : > { %v1318_v34 = vadd.f32 %v1851_v33, %v2243_v61  ;;  %v1312_v35 = vpop.f32.mrb[35].mxu0 }
 0x2bf   : > { %v1313_v36 = vadd.f32 %v2243_v61, %v1312_v35 }
 0x2c0   : > { %1400 = vst [vmem:[%s2250_s9 + $0x98] sm:$0xff] %v1318_v34 }
 0x2c1   : > { %1399 = vst [vmem:[%s2250_s9 + $0x90] sm:$0xff] %v1313_v36  ;;  %v1854_v37 = vpop.f32.mrb[36].mxu0 }
 0x2c2   : > { %v1328_v38 = vadd.f32 %v1854_v37, %v2243_v61  ;;  %v1322_v39 = vpop.f32.mrb[37].mxu0 }
 0x2c3   : > { %v1323_v40 = vadd.f32 %v2243_v61, %v1322_v39 }
 0x2c4   : > { %1402 = vst [vmem:[%s2250_s9 + $0xa8] sm:$0xff] %v1328_v38 }
 0x2c5   : > { %1401 = vst [vmem:[%s2250_s9 + $0xa0] sm:$0xff] %v1323_v40  ;;  %v1857_v41 = vpop.f32.mrb[38].mxu0 }
 0x2c6   : > { %v1338_v42 = vadd.f32 %v1857_v41, %v2243_v61  ;;  %v1332_v43 = vpop.f32.mrb[39].mxu0 }
 0x2c7   : > { %v1333_v44 = vadd.f32 %v2243_v61, %v1332_v43 }
 0x2c8   : > { %1404 = vst [vmem:[%s2250_s9 + $0xb8] sm:$0xff] %v1338_v42 }
 0x2c9   : > { %1403 = vst [vmem:[%s2250_s9 + $0xb0] sm:$0xff] %v1333_v44  ;;  %v1860_v45 = vpop.f32.mrb[40].mxu0 }
 0x2ca   : > { %v1348_v46 = vadd.f32 %v1860_v45, %v2243_v61  ;;  %v1342_v47 = vpop.f32.mrb[41].mxu0 }
 0x2cb   : > { %v1343_v48 = vadd.f32 %v2243_v61, %v1342_v47 }
 0x2cc   : > { %1406 = vst [vmem:[%s2250_s9 + $0xc8] sm:$0xff] %v1348_v46 }
 0x2cd   : > { %1405 = vst [vmem:[%s2250_s9 + $0xc0] sm:$0xff] %v1343_v48  ;;  %v1863_v49 = vpop.f32.mrb[42].mxu0 }
 0x2ce   : > { %v1358_v50 = vadd.f32 %v1863_v49, %v2243_v61  ;;  %v1352_v51 = vpop.f32.mrb[43].mxu0 }
 0x2cf   : > { %v1353_v52 = vadd.f32 %v2243_v61, %v1352_v51 }
 0x2d0   : > { %1408 = vst [vmem:[%s2250_s9 + $0xd8] sm:$0xff] %v1358_v50 }
 0x2d1   : > { %1407 = vst [vmem:[%s2250_s9 + $0xd0] sm:$0xff] %v1353_v52  ;;  %v1866_v53 = vpop.f32.mrb[44].mxu0 }
 0x2d2   : > { %v1368_v54 = vadd.f32 %v1866_v53, %v2243_v61  ;;  %v1362_v55 = vpop.f32.mrb[45].mxu0 }
 0x2d3   : > { %v1363_v56 = vadd.f32 %v2243_v61, %v1362_v55 }
 0x2d4   : > { %1410 = vst [vmem:[%s2250_s9 + $0xe8] sm:$0xff] %v1368_v54 }
 0x2d5   : > { %1409 = vst [vmem:[%s2250_s9 + $0xe0] sm:$0xff] %v1363_v56  ;;  %v1869_v58 = vpop.f32.mrb[46].mxu0 }
 0x2d6   : > { %v1378_v59 = vadd.f32 %v1869_v58, %v2243_v61  ;;  %v1372_v60 = vpop.f32.mrb[47].mxu0 }
 0x2d7   : > { %v1373_v27 = vadd.f32 %v2243_v61, %v1372_v60 }
 0x2d8   : > { %1412 = vst [vmem:[%s2250_s9 + $0xf8] sm:$0xff] %v1378_v59 }
 0x2d9   : > { %1411 = vst [vmem:[%s2250_s9 + $0xf0] sm:$0xff] %v1373_v27 }
 0x2da PF: > { %s17_s24 = sadd.s32 1, %s1918_s24  }
 0x2db   : > { %p14_p4 = scmp.ge.s32.totalorder %s17_s24, 4  }
 0x2dd   :  { %16 = sbr.rel (!%p14_p4) target bundleno = 1 (0x1), region = 78 }

</bundles_post_ra>
